<compile_context>
chip_gen: v7x
topology: tpu7x:2x2x1
jax: 0.10.0
libtpu: 0.0.40
codegen_flags: <defaults>
</compile_context>

<pallas_src>
import math
from functools import partial

import jax
import jax.numpy as jnp
from jax import lax
from jax.experimental import pallas as pl
from jax.experimental.pallas import tpu as pltpu

SAMPLE_RATE = 44100.0
MIN_CUTOFF_FREQ, MAX_CUTOFF_FREQ = 2000.0, 20000.0
MIN_Q, MAX_Q = 0.1, 10.0
NUM_CONTROL_PARAMS = 2

LANE = 128      # batch lanes per tile
UNROLL = 8      # time-loop unroll / slab height (sublane count)


def _round_up(n, m):
    return ((n + m - 1) // m) * m


# ---------------------------------------------------------------------------
# Plain-JAX glue: parameter denormalization + low-pass biquad coefficients
# ---------------------------------------------------------------------------
def denormalize_parameters(control_params):
    # control_params: (bs, 2, 1) in [0, 1] -> dict of (bs, 1) physical values
    cutoff = control_params[:, 0, :] * (MAX_CUTOFF_FREQ - MIN_CUTOFF_FREQ) + MIN_CUTOFF_FREQ
    q = control_params[:, 1, :] * (MAX_Q - MIN_Q) + MIN_Q
    return {"cutoff_freq": cutoff, "q_factor": q}


def compute_coefficients(sample_rate, cutoff_freq, q_factor):
    # cutoff_freq, q_factor: (bs, 1) -> sos (bs, 1, 6) = [b0,b1,b2,a0,a1,a2], a0-normalized.
    # (audio-EQ-cookbook 'low_pass'; gain_db is unused by this filter type, matching dasp biquad)
    w0 = 2.0 * math.pi * (cutoff_freq / sample_rate)
    alpha = jnp.sin(w0) / (2.0 * q_factor)
    cos_w0 = jnp.cos(w0)
    b0 = (1.0 - cos_w0) / 2.0
    b1 = 1.0 - cos_w0
    b2 = (1.0 - cos_w0) / 2.0
    a0 = 1.0 + alpha
    a1 = -2.0 * cos_w0
    a2 = 1.0 - alpha
    b = jnp.concatenate([b0, b1, b2], axis=-1) / a0   # (bs, 3)
    a = jnp.concatenate([a0, a1, a2], axis=-1) / a0   # (bs, 3), a[:,0] == 1
    return jnp.concatenate([b, a], axis=-1)[:, None, :]  # (bs, 1, 6)


# ---------------------------------------------------------------------------
# Pallas kernel: single-section biquad IIR over time, state carried across chunks
# ---------------------------------------------------------------------------
def _lowpass_kernel(coef_ref, x_ref, o_ref, state_ref):
    # coef_ref:  (8, LANE)   rows 0..5 = b0,b1,b2,a0,a1,a2 (a0 == 1), rows 6,7 = padding
    # x_ref/o_ref: (Tc, LANE) time on sublanes, batch on lanes
    # state_ref: (8, LANE)   rows 0..3 = x1,x2,y1,y2 carried across time-chunk grid steps
    Tc = x_ref.shape[0]

    @pl.when(pl.program_id(1) == 0)     # new batch tile: zero filter state
    def _():
        state_ref[...] = jnp.zeros_like(state_ref)

    # coefficients: read once, keep in vregs for the whole chunk
    b0 = coef_ref[0:1, :]
    b1 = coef_ref[1:2, :]
    b2 = coef_ref[2:3, :]
    na1 = -coef_ref[4:5, :]
    na2 = -coef_ref[5:6, :]

    x1 = state_ref[0:1, :]
    x2 = state_ref[1:2, :]
    y1 = state_ref[2:3, :]
    y2 = state_ref[3:4, :]

    def body(i, carry):
        x1, x2, y1, y2 = carry
        base = pl.multiple_of(i * UNROLL, UNROLL)
        xs = x_ref[pl.ds(base, UNROLL), :]          # one (8, LANE) slab load
        ys = []
        for k in range(UNROLL):                     # static 8-way unroll of the recursion
            xt = xs[k:k + 1, :]
            # feedforward terms have no serial dependency; only the y1/y2 chain is serial
            ff = b0 * xt + b1 * x1 + b2 * x2
            yt = ff + na1 * y1 + na2 * y2
            ys.append(yt)
            x2 = x1
            x1 = xt
            y2 = y1
            y1 = yt
        o_ref[pl.ds(base, UNROLL), :] = jnp.concatenate(ys, axis=0)  # one (8, LANE) store
        return (x1, x2, y1, y2)

    x1, x2, y1, y2 = lax.fori_loop(0, Tc // UNROLL, body, (x1, x2, y1, y2))

    # persist state for the next time chunk of this batch tile (full unmasked (8,128) store;
    # rows 4..7 are padding copies and never read)
    state_ref[...] = jnp.concatenate([x1, x2, y1, y2, x1, x2, y1, y2], axis=0)


def sosfilt_lowpass_pallas(sos, x, *, max_time_chunk=4096):
    # sos: (bs, 1, 6), x: (bs, 1, T)  ->  (bs, 1, T)
    bs, chs, T = x.shape
    assert chs == 1
    n_btiles = _round_up(bs, LANE) // LANE
    Bp = n_btiles * LANE

    Tc = min(max_time_chunk, _round_up(T, UNROLL))   # time chunk, multiple of 8
    T_pad = _round_up(T, Tc)
    n_tchunks = T_pad // Tc

    # kernel layout: time-major (T_pad, Bp); batch zero-padded onto the 128-lane axis
    x_k = jnp.zeros((T_pad, Bp), jnp.float32).at[:T, :bs].set(x[:, 0, :].T)
    coef = jnp.zeros((8, Bp), jnp.float32).at[:6, :bs].set(sos[:, 0, :].T)

    y_k = pl.pallas_call(
        _lowpass_kernel,
        out_shape=jax.ShapeDtypeStruct((T_pad, Bp), jnp.float32),
        grid_spec=pltpu.PrefetchScalarGridSpec(
            num_scalar_prefetch=0,
            grid=(n_btiles, n_tchunks),
            in_specs=[
                pl.BlockSpec((8, LANE), lambda bt, tt: (0, bt)),        # coefficients
                pl.BlockSpec((Tc, LANE), lambda bt, tt: (tt, bt)),      # x time chunk
            ],
            out_specs=pl.BlockSpec((Tc, LANE), lambda bt, tt: (tt, bt)),
            scratch_shapes=[pltpu.VMEM((8, LANE), jnp.float32)],        # filter state carry
        ),
        compiler_params=pltpu.CompilerParams(
            dimension_semantics=("parallel", "arbitrary"),
            vmem_limit_bytes=32 * 1024 * 1024,   # chunked design needs ~10 MiB; safe on v5e/v6e/v7x
        ),
    )(coef, x_k)

    return y_k[:T, :bs].T[:, None, :]


@partial(jax.jit, static_argnames=("sample_rate", "max_time_chunk"))
def lowpass_forward(x, control_params, sample_rate=SAMPLE_RATE, max_time_chunk=4096):
    """Lowpass.forward for control_type='static' / 'static-cond', train=False."""
    bs_x, chs_x, _ = x.shape
    bs_c, chs_c, seq_len_c = control_params.shape
    assert bs_x == bs_c and chs_x == 1 and chs_c == NUM_CONTROL_PARAMS and seq_len_c == 1
    param_dict = denormalize_parameters(control_params)
    sos = compute_coefficients(sample_rate, param_dict["cutoff_freq"], param_dict["q_factor"])
    y = sosfilt_lowpass_pallas(sos, x, max_time_chunk=max_time_chunk)
    return y, param_dict


# ---------------------------------------------------------------------------
# Pure-JAX reference (lax.scan) for a correctness sanity check
# ---------------------------------------------------------------------------
def _sosfilt_ref(sos, x):
    y = x[:, 0, :]  # (bs, T)
    b0, b1, b2 = sos[:, 0, 0], sos[:, 0, 1], sos[:, 0, 2]
    a1, a2 = sos[:, 0, 4], sos[:, 0, 5]

    def step(carry, xt):
        x1, x2, y1, y2 = carry
        yt = b0 * xt + b1 * x1 + b2 * x2 - a1 * y1 - a2 * y2
        return (xt, x1, yt, y1), yt

    init = tuple(jnp.zeros_like(y[:, 0]) for _ in range(4))
    _, y_t = lax.scan(step, init, y.T)
    return y_t.T[:, None, :]


if __name__ == "__main__":
    key = jax.random.PRNGKey(0)
    kx, kc = jax.random.split(key)
    bs, T = 2, 1000   # T not a multiple of the chunk -> exercises time padding + state carry
    x = jax.random.normal(kx, (bs, 1, T), dtype=jnp.float32)
    control_params = jax.random.uniform(kc, (bs, NUM_CONTROL_PARAMS, 1), dtype=jnp.float32)

    # small time chunk so the state-carry-across-grid-steps path is exercised
    y, pdict = lowpass_forward(x, control_params, max_time_chunk=256)
    y = jax.block_until_ready(y)
    assert y.shape == (bs, 1, T) and y.dtype == jnp.float32
    assert pdict["cutoff_freq"].shape == (bs, 1) and pdict["q_factor"].shape == (bs, 1)

    # sanity check against the pure-JAX scan reference
    sos_ref = compute_coefficients(SAMPLE_RATE, pdict["cutoff_freq"], pdict["q_factor"])
    y_ref = jax.block_until_ready(_sosfilt_ref(sos_ref, x))
    err = float(jnp.max(jnp.abs(y - y_ref)))
    assert jnp.allclose(y, y_ref, rtol=1e-3, atol=1e-3), err

    print("KERNEL_OK")
</pallas_src>

<mosaic_0001>
module attributes {stable_mosaic.version = 11 : i64} {
  func.func @_lowpass_kernel(%arg0: i32, %arg1: i32, %arg2: memref<8x128xf32, #tpu.memory_space<vmem>>, %arg3: memref<256x128xf32, #tpu.memory_space<vmem>>, %arg4: memref<256x128xf32, #tpu.memory_space<vmem>>, %arg5: memref<8x128xf32, #tpu.memory_space<vmem>>) attributes {dimension_semantics = [#tpu.dimension_semantics<parallel>, #tpu.dimension_semantics<arbitrary>], iteration_bounds = array<i64: 1, 4>, scalar_prefetch = 0 : i64, scratch_operands = 1 : i64, tpu.core_type = #tpu.core_type<tc>, window_params = [{transform_indices = @transform_0, window_bounds = array<i64: 8, 128>}, {transform_indices = @transform_1, window_bounds = array<i64: 256, 128>}, {transform_indices = @transform_2, window_bounds = array<i64: 256, 128>}]} {
    %c0_i32 = arith.constant 0 : i32
    %0 = arith.cmpi eq, %arg1, %c0_i32 : i32
    %1 = arith.extui %0 : i1 to i32
    %c0_i32_0 = arith.constant 0 : i32
    %2 = arith.cmpi ne, %1, %c0_i32_0 : i32
    scf.if %2 {
      %cst_18 = arith.constant 0.000000e+00 : f32
      %20 = vector.broadcast %cst_18 : f32 to vector<8x128xf32>
      %c0_19 = arith.constant 0 : index
      %c0_20 = arith.constant 0 : index
      %21 = vector.load %arg5[%c0_19, %c0_20] : memref<8x128xf32, #tpu.memory_space<vmem>>, vector<8x128xf32>
      tpu.vector_store %arg5[%c0_19, %c0_20], %20 {strides = array<i32>} : memref<8x128xf32, #tpu.memory_space<vmem>>, vector<8x128xf32>,
    } else {
    }
    %c0 = arith.constant 0 : index
    %c0_1 = arith.constant 0 : index
    %3 = vector.load %arg2[%c0, %c0_1] : memref<8x128xf32, #tpu.memory_space<vmem>>, vector<1x128xf32>
    %c1 = arith.constant 1 : index
    %c0_2 = arith.constant 0 : index
    %4 = vector.load %arg2[%c1, %c0_2] : memref<8x128xf32, #tpu.memory_space<vmem>>, vector<1x128xf32>
    %c2 = arith.constant 2 : index
    %c0_3 = arith.constant 0 : index
    %5 = vector.load %arg2[%c2, %c0_3] : memref<8x128xf32, #tpu.memory_space<vmem>>, vector<1x128xf32>
    %c4 = arith.constant 4 : index
    %c0_4 = arith.constant 0 : index
    %6 = vector.load %arg2[%c4, %c0_4] : memref<8x128xf32, #tpu.memory_space<vmem>>, vector<1x128xf32>
    %cst = arith.constant 0.000000e+00 : f32
    %7 = vector.broadcast %cst : f32 to vector<1x128xf32>
    %8 = arith.subf %7, %6 : vector<1x128xf32>
    %c5 = arith.constant 5 : index
    %c0_5 = arith.constant 0 : index
    %9 = vector.load %arg2[%c5, %c0_5] : memref<8x128xf32, #tpu.memory_space<vmem>>, vector<1x128xf32>
    %cst_6 = arith.constant 0.000000e+00 : f32
    %10 = vector.broadcast %cst_6 : f32 to vector<1x128xf32>
    %11 = arith.subf %10, %9 : vector<1x128xf32>
    %c0_7 = arith.constant 0 : index
    %c0_8 = arith.constant 0 : index
    %12 = vector.load %arg5[%c0_7, %c0_8] : memref<8x128xf32, #tpu.memory_space<vmem>>, vector<1x128xf32>
    %c1_9 = arith.constant 1 : index
    %c0_10 = arith.constant 0 : index
    %13 = vector.load %arg5[%c1_9, %c0_10] : memref<8x128xf32, #tpu.memory_space<vmem>>, vector<1x128xf32>
    %c2_11 = arith.constant 2 : index
    %c0_12 = arith.constant 0 : index
    %14 = vector.load %arg5[%c2_11, %c0_12] : memref<8x128xf32, #tpu.memory_space<vmem>>, vector<1x128xf32>
    %c3 = arith.constant 3 : index
    %c0_13 = arith.constant 0 : index
    %15 = vector.load %arg5[%c3, %c0_13] : memref<8x128xf32, #tpu.memory_space<vmem>>, vector<1x128xf32>
    %c0_i32_14 = arith.constant 0 : i32
    %c32_i32 = arith.constant 32 : i32
    %16 = arith.addi %c0_i32_14, %c32_i32 : i32
    %c1_i32 = arith.constant 1 : i32
    %17:4 = scf.for %arg6 = %c0_i32_14 to %16 step %c1_i32 iter_args(%arg7 = %12, %arg8 = %13, %arg9 = %14, %arg10 = %15) -> (vector<1x128xf32>, vector<1x128xf32>, vector<1x128xf32>, vector<1x128xf32>)  : i32 {
      %c8_i32 = arith.constant 8 : i32
      %20 = arith.muli %arg6, %c8_i32 : i32
      %21 = tpu.assume_multiple %20, 8 : i32
      %22 = arith.index_cast %21 : i32 to index
      %c0_18 = arith.constant 0 : index
      %23 = vector.load %arg3[%22, %c0_18] : memref<256x128xf32, #tpu.memory_space<vmem>>, vector<8x128xf32>
      %24 = vector.extract_strided_slice %23 {offsets = [0, 0], sizes = [1, 128], strides = [1, 1]} : vector<8x128xf32> to vector<1x128xf32>
      %25 = arith.mulf %3, %24 : vector<1x128xf32>
      %26 = arith.mulf %4, %arg7 : vector<1x128xf32>
      %27 = arith.addf %25, %26 : vector<1x128xf32>
      %28 = arith.mulf %5, %arg8 : vector<1x128xf32>
      %29 = arith.addf %27, %28 : vector<1x128xf32>
      %30 = arith.mulf %8, %arg9 : vector<1x128xf32>
      %31 = arith.addf %29, %30 : vector<1x128xf32>
      %32 = arith.mulf %11, %arg10 : vector<1x128xf32>
      %33 = arith.addf %31, %32 : vector<1x128xf32>
      %34 = vector.extract_strided_slice %23 {offsets = [1, 0], sizes = [1, 128], strides = [1, 1]} : vector<8x128xf32> to vector<1x128xf32>
      %35 = arith.mulf %3, %34 : vector<1x128xf32>
      %36 = arith.mulf %4, %24 : vector<1x128xf32>
      %37 = arith.addf %35, %36 : vector<1x128xf32>
      %38 = arith.mulf %5, %arg7 : vector<1x128xf32>
      %39 = arith.addf %37, %38 : vector<1x128xf32>
      %40 = arith.mulf %8, %33 : vector<1x128xf32>
      %41 = arith.addf %39, %40 : vector<1x128xf32>
      %42 = arith.mulf %11, %arg9 : vector<1x128xf32>
      %43 = arith.addf %41, %42 : vector<1x128xf32>
      %44 = vector.extract_strided_slice %23 {offsets = [2, 0], sizes = [1, 128], strides = [1, 1]} : vector<8x128xf32> to vector<1x128xf32>
      %45 = arith.mulf %3, %44 : vector<1x128xf32>
      %46 = arith.mulf %4, %34 : vector<1x128xf32>
      %47 = arith.addf %45, %46 : vector<1x128xf32>
      %48 = arith.mulf %5, %24 : vector<1x128xf32>
      %49 = arith.addf %47, %48 : vector<1x128xf32>
      %50 = arith.mulf %8, %43 : vector<1x128xf32>
      %51 = arith.addf %49, %50 : vector<1x128xf32>
      %52 = arith.mulf %11, %33 : vector<1x128xf32>
      %53 = arith.addf %51, %52 : vector<1x128xf32>
      %54 = vector.extract_strided_slice %23 {offsets = [3, 0], sizes = [1, 128], strides = [1, 1]} : vector<8x128xf32> to vector<1x128xf32>
      %55 = arith.mulf %3, %54 : vector<1x128xf32>
      %56 = arith.mulf %4, %44 : vector<1x128xf32>
      %57 = arith.addf %55, %56 : vector<1x128xf32>
      %58 = arith.mulf %5, %34 : vector<1x128xf32>
      %59 = arith.addf %57, %58 : vector<1x128xf32>
      %60 = arith.mulf %8, %53 : vector<1x128xf32>
      %61 = arith.addf %59, %60 : vector<1x128xf32>
      %62 = arith.mulf %11, %43 : vector<1x128xf32>
      %63 = arith.addf %61, %62 : vector<1x128xf32>
      %64 = vector.extract_strided_slice %23 {offsets = [4, 0], sizes = [1, 128], strides = [1, 1]} : vector<8x128xf32> to vector<1x128xf32>
      %65 = arith.mulf %3, %64 : vector<1x128xf32>
      %66 = arith.mulf %4, %54 : vector<1x128xf32>
      %67 = arith.addf %65, %66 : vector<1x128xf32>
      %68 = arith.mulf %5, %44 : vector<1x128xf32>
      %69 = arith.addf %67, %68 : vector<1x128xf32>
      %70 = arith.mulf %8, %63 : vector<1x128xf32>
      %71 = arith.addf %69, %70 : vector<1x128xf32>
      %72 = arith.mulf %11, %53 : vector<1x128xf32>
      %73 = arith.addf %71, %72 : vector<1x128xf32>
      %74 = vector.extract_strided_slice %23 {offsets = [5, 0], sizes = [1, 128], strides = [1, 1]} : vector<8x128xf32> to vector<1x128xf32>
      %75 = arith.mulf %3, %74 : vector<1x128xf32>
      %76 = arith.mulf %4, %64 : vector<1x128xf32>
      %77 = arith.addf %75, %76 : vector<1x128xf32>
      %78 = arith.mulf %5, %54 : vector<1x128xf32>
      %79 = arith.addf %77, %78 : vector<1x128xf32>
      %80 = arith.mulf %8, %73 : vector<1x128xf32>
      %81 = arith.addf %79, %80 : vector<1x128xf32>
      %82 = arith.mulf %11, %63 : vector<1x128xf32>
      %83 = arith.addf %81, %82 : vector<1x128xf32>
      %84 = vector.extract_strided_slice %23 {offsets = [6, 0], sizes = [1, 128], strides = [1, 1]} : vector<8x128xf32> to vector<1x128xf32>
      %85 = arith.mulf %3, %84 : vector<1x128xf32>
      %86 = arith.mulf %4, %74 : vector<1x128xf32>
      %87 = arith.addf %85, %86 : vector<1x128xf32>
      %88 = arith.mulf %5, %64 : vector<1x128xf32>
      %89 = arith.addf %87, %88 : vector<1x128xf32>
      %90 = arith.mulf %8, %83 : vector<1x128xf32>
      %91 = arith.addf %89, %90 : vector<1x128xf32>
      %92 = arith.mulf %11, %73 : vector<1x128xf32>
      %93 = arith.addf %91, %92 : vector<1x128xf32>
      %94 = vector.extract_strided_slice %23 {offsets = [7, 0], sizes = [1, 128], strides = [1, 1]} : vector<8x128xf32> to vector<1x128xf32>
      %95 = arith.mulf %3, %94 : vector<1x128xf32>
      %96 = arith.mulf %4, %84 : vector<1x128xf32>
      %97 = arith.addf %95, %96 : vector<1x128xf32>
      %98 = arith.mulf %5, %74 : vector<1x128xf32>
      %99 = arith.addf %97, %98 : vector<1x128xf32>
      %100 = arith.mulf %8, %93 : vector<1x128xf32>
      %101 = arith.addf %99, %100 : vector<1x128xf32>
      %102 = arith.mulf %11, %83 : vector<1x128xf32>
      %103 = arith.addf %101, %102 : vector<1x128xf32>
      %104 = tpu.concatenate %33, %43, %53, %63, %73, %83, %93, %103 in 0 : vector<1x128xf32>, vector<1x128xf32>, vector<1x128xf32>, vector<1x128xf32>, vector<1x128xf32>, vector<1x128xf32>, vector<1x128xf32>, vector<1x128xf32> -> vector<8x128xf32>
      %105 = arith.index_cast %21 : i32 to index
      %c0_19 = arith.constant 0 : index
      %106 = vector.load %arg4[%105, %c0_19] : memref<256x128xf32, #tpu.memory_space<vmem>>, vector<8x128xf32>
      tpu.vector_store %arg4[%105, %c0_19], %104 {strides = array<i32>} : memref<256x128xf32, #tpu.memory_space<vmem>>, vector<8x128xf32>,
      scf.yield %94, %84, %103, %93 : vector<1x128xf32>, vector<1x128xf32>, vector<1x128xf32>, vector<1x128xf32>
    }
    %c32_i32_15 = arith.constant 32 : i32
    %18 = tpu.concatenate %17#0, %17#1, %17#2, %17#3, %17#0, %17#1, %17#2, %17#3 in 0 : vector<1x128xf32>, vector<1x128xf32>, vector<1x128xf32>, vector<1x128xf32>, vector<1x128xf32>, vector<1x128xf32>, vector<1x128xf32>, vector<1x128xf32> -> vector<8x128xf32>
    %c0_16 = arith.constant 0 : index
    %c0_17 = arith.constant 0 : index
    %19 = vector.load %arg5[%c0_16, %c0_17] : memref<8x128xf32, #tpu.memory_space<vmem>>, vector<8x128xf32>
    tpu.vector_store %arg5[%c0_16, %c0_17], %18 {strides = array<i32>} : memref<8x128xf32, #tpu.memory_space<vmem>>, vector<8x128xf32>,
    return
  }
  func.func @transform_0(%arg0: i32, %arg1: i32) -> (i32, i32) {
    %c0_i32 = arith.constant 0 : i32
    %c0_i32_0 = arith.constant 0 : i32
    return %c0_i32, %arg0 : i32, i32
  }
  func.func @transform_1(%arg0: i32, %arg1: i32) -> (i32, i32) {
    %c0_i32 = arith.constant 0 : i32
    return %arg1, %arg0 : i32, i32
  }
  func.func @transform_2(%arg0: i32, %arg1: i32) -> (i32, i32) {
    %c0_i32 = arith.constant 0 : i32
    return %arg1, %arg0 : i32, i32
  }
}

</mosaic_0001>

<bundles_post_ra>
// kernel: lowpass_forward.1
= control target key start
LH: loop header
LB: loop body
LE: loop exit
PB: predicated region body
PF: predicated region fallthrough
CT: control target
= control target key end

     0   :  { %s654_s9 = smov 0   ;;  %s656_s10 = smov 0   ;;  %s818_s0 = inlined_call_operand.vmem [shape: f32[8,128], index: 0, kind: input, shape index: {}]   ;;  %s819_s1 = inlined_call_operand.vmem [shape: f32[1024,128], index: 1, kind: input, shape index: {}]   ;;  %s820_s2 = inlined_call_operand.vmem [shape: f32[1024,128], index: 2, kind: output, shape index: {}]  }
   0x1   :  { %s658_s11 = smov 0  }
   0x2 LB: > { %s21_s12 = sadd.s32 1, %s612_s10  ;;  %p500_p0 = scmp.ge.s32.totalorder %s616_s11, 1  ;;  %s616_s11 = sphi %s658_s11, %s12_s11   ;;  %s612_s10 = sphi %s656_s10, %s827_s10   ;;  %s608_s9 = sphi %s654_s9, %s826_s9  }
   0x3   : > { %p22_p1 = scmp.ge.s32.totalorder %s21_s12, 4  ;;  %p141_p2 = scmp.lt.s32.totalorder %s616_s11, 5 }
   0x5   : > { %s829_s12 = smov (%p22_p1, %s21_s12), 0  ;;  %p142_p3 = pnand %p500_p0, %p141_p2 }
   0x6   : > { %s501_s13 = sshll.u32 (!%p142_p3), %s608_s9, 5  ;;  %p505_p5 = scmp.ne.s32.totalorder (!%p142_p3), %s608_s9, 0 }
   0x7   : > { %145 = sbr.rel (%p142_p3) target bundleno = 89 (0x59), region = 28  ;;  %p178_p4 = scmp.lt.s32.totalorder (!%p142_p3), %s501_s13, 127 }
   0xe   : > { %s831_s13 = smov (!%p178_p4, %s501_s13), 127  ;;  %198 = sbr.rel (%p505_p5) target bundleno = 21 (0x15), region = 32 }
   0xf   : > { %s502_s14 = sshll.u32 %s831_s13, 3  ;;  %v638_v0 = vmov (!%p505_p5), 0.0  }
  0x10   : > { %s675_s17 = scalar_lea.vmem %s819_s1, %s502_s14  ;;  %s680_s20 = scalar_lea.vmem %s820_s2, %s502_s14  ;;  %199 = vst [vmem:[#allocation2] sm:$0xff] (!%p505_p5), %v638_v0 }
  0x15 PF: > { %v685_v1 = vld [vmem:[%s818_s0] sm:$0x1]  ;;  %v690_v2 = vld [vmem:[%s818_s0 + $0x1] sm:$0x1]  ;;  %v695_v3 = vld [vmem:[%s818_s0 + $0x2] sm:$0x1] }
  0x16   : > { %v203_v4 = vld [vmem:[%s818_s0 + $0x4] sm:$0x1]  ;;  %v205_v5 = vld [vmem:[%s818_s0 + $0x5] sm:$0x1]  ;;  %s715_s3 = smov 0  }
  0x17   : > { %v207_v6 = vld [vmem:[#allocation2] sm:$0x1]   ;;  %v703_v7 = vsub.f32 0.0, %v203_v4  ;;  %v705_v8 = vsub.f32 0.0, %v205_v5  ;;  %v208_v9 = vld [vmem:[#allocation2 + $0x1] sm:$0x1]  }
  0x18   : > { %v209_v10 = vld [vmem:[#allocation2 + $0x2] sm:$0x1]   ;;  %v210_v11 = vld [vmem:[#allocation2 + $0x3] sm:$0x1]  }
  0x19 LB: >> { %s506_s4 = sshll.u32 %s636_s3, 3  ;;  %v225_v12 = vmul.f32 %v632_v6, %v690_v2  ;;  %v227_v15 = vmul.f32 %v628_v9, %v695_v3  ;;  %v229_v19 = vmul.f32 %v624_v10, %v703_v7  ;;  %v231_v23 = vmul.f32 %v620_v11, %v705_v8  ;;  %s216_s3 = sadd.s32 1, %s636_s3   ;;  %s636_s3 = sphi %s715_s3, %s216_s3   ;;  %v632_v6 = vphi %v207_v6, %v825_v6   ;;  %v628_v9 = vphi %v208_v9, %v824_v9   ;;  %v624_v10 = vphi %v209_v10, %v823_v10   ;;  %v620_v11 = vphi %v210_v11, %v822_v11  }
  0x1a   : >> { %s222_s5 = scalar_lea.vmem %s675_s17, %s506_s4  ;;  %v239_v25 = vmul.f32 %v632_v6, %v695_v3  ;;  %v243_v33 = vmul.f32 %v624_v10, %v705_v8  ;;  %vm332_vm0 = vcmask 1040384   ;;  %vm334_vm1 = vcmask 1041408   ;;  %s346_s6 = scalar_lea.vmem %s680_s20, %s506_s4 }
  0x1b   : >> { %v223_v13 = vld [vmem:[%s222_s5] sm:$0xff]  ;;  %vm336_vm2 = vcmask 1042432   ;;  %vm338_vm3 = vcmask 1043456   ;;  %vm340_vm4 = vcmask 1044480   ;;  %vm342_vm5 = vcmask 1045504   ;;  %p213_p6 = scmp.ge.s32.totalorder %s216_s3, 32  }
  0x1c   : >> { %v224_v14 = vmul.f32 %v223_v13, %v685_v1  ;;  %v234_v16 = vrot.slane %v223_v13, 1  ;;  %v237_v17 = vmul.f32 %v223_v13, %v690_v2  ;;  %v245_v21 = vrot.slane %v223_v13, 2 }
  0x1d   : >> { %v256_v31 = vrot.slane %v223_v13, 3  ;;  %v250_v35 = vmul.f32 %v223_v13, %v695_v3  ;;  %v267_v41 = vrot.slane %v223_v13, 4  ;;  %v278_v51 = vrot.slane %v223_v13, 5 }
  0x1e   : >> { %v226_v18 = vadd.f32 %v225_v12, %v224_v14  ;;  %v236_v20 = vmul.f32 %v234_v16, %v685_v1  ;;  %v247_v27 = vmul.f32 %v245_v21, %v685_v1  ;;  %v248_v28 = vmul.f32 %v234_v16, %v690_v2 }
  0x1f   : >> { %v258_v37 = vmul.f32 %v256_v31, %v685_v1  ;;  %v259_v38 = vmul.f32 %v245_v21, %v690_v2  ;;  %v261_v45 = vmul.f32 %v234_v16, %v695_v3  ;;  %v269_v47 = vmul.f32 %v267_v41, %v685_v1 }
  0x20   : >> { %v228_v22 = vadd.f32 %v227_v15, %v226_v18  ;;  %v238_v24 = vadd.f32 %v237_v17, %v236_v20  ;;  %v249_v34 = vadd.f32 %v248_v28, %v247_v27  ;;  %v270_v48 = vmul.f32 %v256_v31, %v690_v2 }
  0x21   : >> { %v260_v44 = vadd.f32 %v259_v38, %v258_v37  ;;  %v272_v55 = vmul.f32 %v245_v21, %v695_v3  ;;  %v280_v57 = vmul.f32 %v278_v51, %v685_v1  ;;  %v281_v58 = vmul.f32 %v267_v41, %v690_v2 }
  0x22   : >> { %v230_v26 = vadd.f32 %v229_v19, %v228_v22  ;;  %v240_v30 = vadd.f32 %v239_v25, %v238_v24  ;;  %v251_v40 = vadd.f32 %v250_v35, %v249_v34  ;;  %v271_v54 = vadd.f32 %v270_v48, %v269_v47 }
  0x23   : >> { %v262_v50 = vadd.f32 %v261_v45, %v260_v44  ;;  %v753_v9 = vrot.slane %v223_v13, 6   ;;  %v282_v0 = vadd.f32 %v281_v58, %v280_v57  ;;  %v283_v4 = vmul.f32 %v256_v31, %v695_v3 }
  0x24   : >> { %v232_v29 = vadd.f32 %v231_v23, %v230_v26  ;;  %v273_v60 = vadd.f32 %v272_v55, %v271_v54  ;;  %v292_v10 = vmul.f32 %v278_v51, %v690_v2  ;;  %v761_v14 = vrot.slane %v223_v13, 7  }
  0x25   : >> { %v821_v61 = vmov %v753_v9  ;;  %v284_v12 = vadd.f32 %v283_v4, %v282_v0  ;;  %v294_v18 = vmul.f32 %v267_v41, %v695_v3  ;;  %v305_v31 = vmul.f32 %v278_v51, %v695_v3 }
  0x26   : >> { %v241_v32 = vmul.f32 %v232_v29, %v703_v7  ;;  %v254_v43 = vmul.f32 %v232_v29, %v705_v8  ;;  %v291_v6 = vmul.f32 %v821_v61, %v685_v1  ;;  %v302_v21 = vmul.f32 %v761_v14, %v685_v1 }
  0x27   : >> { %v303_v22 = vmul.f32 %v821_v61, %v690_v2  ;;  %vm344_vm6 = vcmask 1046528   ;;  %v349_v47 = vrot.slane (%p213_p6), %v821_v61, 7  ;;  %v360_v51 = vrot.slane (%p213_p6), %v821_v61, 3 }
  0x28   : >> { %v242_v36 = vadd.f32 %v241_v32, %v240_v30  ;;  %v293_v17 = vadd.f32 %v292_v10, %v291_v6  ;;  %v825_v6 = vmov %v761_v14 }
  0x29   : >> { %v304_v30 = vadd.f32 %v303_v22, %v302_v21 }
  0x2a   : >> { %v244_v39 = vadd.f32 %v243_v33, %v242_v36  ;;  %v295_v24 = vadd.f32 %v294_v18, %v293_v17 }
  0x2b   : >> { %v306_v35 = vadd.f32 %v305_v31, %v304_v30 }
  0x2c   : >> { %v252_v42 = vmul.f32 %v244_v39, %v703_v7  ;;  %v265_v53 = vmul.f32 %v244_v39, %v705_v8  ;;  %v312_v15 = vrot.slane %v244_v39, 7 }
  0x2e   : >> { %v253_v46 = vadd.f32 %v252_v42, %v251_v40  ;;  %v333_v13 = vsel %vm332_vm0, %v232_v29, %v312_v15 }
  0x30   : >> { %v255_v49 = vadd.f32 %v254_v43, %v253_v46 }
  0x32   : >> { %v263_v52 = vmul.f32 %v255_v49, %v703_v7  ;;  %v276_v63 = vmul.f32 %v255_v49, %v705_v8  ;;  %v315_v19 = vrot.slane %v255_v49, 6 }
  0x34   : >> { %v264_v56 = vadd.f32 %v263_v52, %v262_v50  ;;  %v335_v26 = vsel %vm334_vm1, %v333_v13, %v315_v19  ;;  %v358_v50 = vrot.slane (%p213_p6), %v761_v14, 4  ;;  %v367_v52 = vsel (%p213_p6), %vm332_vm0, %v761_v14, %v349_v47 }
  0x36   : >> { %v266_v59 = vadd.f32 %v265_v53, %v264_v56 }
  0x38   : >> { %v274_v62 = vmul.f32 %v266_v59, %v703_v7  ;;  %v287_v16 = vmul.f32 %v266_v59, %v705_v8  ;;  %v318_v25 = vrot.slane %v266_v59, 5 }
  0x3a   : >> { %v275_v5 = vadd.f32 %v274_v62, %v273_v60  ;;  %v337_v34 = vsel %vm336_vm2, %v335_v26, %v318_v25 }
  0x3c   : >> { %v277_v11 = vadd.f32 %v276_v63, %v275_v5 }
  0x3e   : >> { %v285_v9 = vmul.f32 %v277_v11, %v703_v7  ;;  %v298_v28 = vmul.f32 %v277_v11, %v705_v8  ;;  %v321_v32 = vrot.slane %v277_v11, 4 }
  0x40   : >> { %v286_v20 = vadd.f32 %v285_v9, %v284_v12  ;;  %v339_v37 = vsel %vm338_vm3, %v337_v34, %v321_v32  ;;  %v824_v9 = vmov %v821_v61 }
  0x42   : >> { %v288_v23 = vadd.f32 %v287_v16, %v286_v20 }
  0x44   : >> { %v296_v27 = vmul.f32 %v288_v23, %v703_v7  ;;  %v324_v36 = vrot.slane %v288_v23, 3  ;;  %v309_v39 = vmul.f32 %v288_v23, %v705_v8 }
  0x46   : >> { %v297_v33 = vadd.f32 %v296_v27, %v295_v24  ;;  %v341_v42 = vsel %vm340_vm4, %v339_v37, %v324_v36 }
  0x48   : >> { %v299_v29 = vadd.f32 %v298_v28, %v297_v33  }
  0x4a   : >> { %v307_v38 = vmul.f32 %v299_v29, %v703_v7  ;;  %v327_v40 = vrot.slane %v299_v29, 2  ;;  %v822_v11 = vmov %v299_v29  ;;  %v355_v49 = vrot.slane (%p213_p6), %v299_v29, 5 }
  0x4b   : > { %v364_v55 = vrot.slane (%p213_p6), %v299_v29, 1 }
  0x4c   : >> { %v308_v41 = vadd.f32 %v307_v38, %v306_v35  ;;  %v343_v44 = vsel %vm342_vm5, %v341_v42, %v327_v40 }
  0x4d   : > { %215 = sbr.rel (!%p213_p6) target bundleno = 25 (0x19), region = 74 }
  0x4e   : >> { %v310_v43 = vadd.f32 %v309_v39, %v308_v41  }
  0x50   : >> { %v330_v45 = vrot.slane %v310_v43, 1  ;;  %v823_v10 = vmov %v310_v43  ;;  %v352_v48 = vrot.slane (%p213_p6), %v310_v43, 6  ;;  %v362_v53 = vrot.slane (%p213_p6), %v310_v43, 2 }
  0x52   : >> { %v345_v46 = vsel %vm344_vm6, %v343_v44, %v330_v45  ;;  %v369_v54 = vsel (%p213_p6), %vm334_vm1, %v367_v52, %v352_v48 }
  0x53   : >> { %347 = vst [vmem:[%s346_s6] sm:$0xff] %v345_v46  ;;  %v371_v56 = vsel (%p213_p6), %vm336_vm2, %v369_v54, %v355_v49 }
  0x54   : > { %v373_v57 = vsel %vm338_vm3, %v371_v56, %v358_v50 }
  0x55   : > { %v375_v1 = vsel %vm340_vm4, %v373_v57, %v360_v51 }
  0x56   : > { %v377_v2 = vsel %vm342_vm5, %v375_v1, %v362_v53 }
  0x57   : > { %v379_v3 = vsel %vm344_vm6, %v377_v2, %v364_v55 }
  0x58   : > { %380 = vst [vmem:[#allocation2] sm:$0xff] %v379_v3 }
  0x59 PF: > { %s12_s11 = sadd.s32 1, %s616_s11   ;;  %s826_s9 = smov %s612_s10 }
  0x5a   : > { %p9_p7 = scmp.ge.s32.totalorder %s12_s11, 6   ;;  %s827_s10 = smov %s829_s12 }
  0x5c   :  { %11 = sbr.rel (!%p9_p7) target bundleno = 2 (0x2), region = 85 }

</bundles_post_ra>
